<compile_context>
chip_gen: v5e
topology: v5e:2x2
jax: 0.10.0
libtpu: 0.0.40
codegen_flags: <defaults>
</compile_context>

<pallas_src>
import functools

import jax
import jax.numpy as jnp
from jax.experimental import pallas as pl
from jax.experimental.pallas import tpu as pltpu


def _fused_cnn_kernel(x_ref, *refs, window_sizes, compute_dtype):
    """Fused multi-window Conv2d + global max pool.

    x_ref : (bb, S, D)        batch tile of the input
    refs  : (w_0, ..., w_{nw-1}, b_ref, o_ref)
      w_i : (w_i * D, F)      im2col-flattened conv weight for window i
      b   : (1, nw * F)       all biases, concatenated along filters
      o   : (bb, nw * F)      stacked max-pooled conv outputs
    """
    nw = len(window_sizes)
    w_refs = refs[:nw]
    b_ref = refs[nw]
    o_ref = refs[nw + 1]

    x = x_ref[...].astype(compute_dtype)                  # (bb, S, D)
    S = x.shape[1]

    outs = []
    for widx, w in enumerate(window_sizes):
        T = S - w + 1                                      # valid conv positions
        # im2col: cols[:, t, i*D + j] == x[:, t + i, j]  -> (bb, T, w*D)
        cols = jnp.concatenate([x[:, i:i + T, :] for i in range(w)], axis=-1)
        # One MXU matmul per window: M = bb*T, K = w*D, N = F, f32 accumulate.
        conv = jnp.einsum(
            'btk,kf->btf', cols, w_refs[widx][...].astype(compute_dtype),
            preferred_element_type=jnp.float32)            # (bb, T, F)
        # MaxPool2d over all conv positions == global max over T.
        outs.append(jnp.max(conv, axis=1))                 # (bb, F)

    stacked = jnp.concatenate(outs, axis=-1)               # (bb, nw*F)
    # Bias is constant over positions: max(conv + b) == max(conv) + b.
    o_ref[...] = (stacked + b_ref[...]).astype(o_ref.dtype)


def fused_conv_global_max(x, weights, bias, window_sizes,
                          compute_dtype=jnp.float32):
    """x: (B, S, D) f32; weights[i]: (w_i*D, F) f32; bias: (1, nw*F) f32.

    Returns (B, nw*F) f32: per-window, per-filter global max of the conv.
    """
    B, S, D = x.shape
    NF = bias.shape[-1]

    # One 'parallel' grid axis over batch tiles: shards across v7x's 2 TCs and
    # pipelines x DMAs for large B.  Tile is either B or a multiple of 8 so the
    # (bb, NF) output block satisfies the (8, 128) rule.
    bb = 8 if (B > 8 and B % 8 == 0) else B
    grid = (B // bb,)

    in_specs = [pl.BlockSpec((bb, S, D), lambda i: (i, 0, 0))]
    for wt in weights:
        in_specs.append(pl.BlockSpec(wt.shape, lambda i: (0, 0)))
    in_specs.append(pl.BlockSpec((1, NF), lambda i: (0, 0)))

    kernel = functools.partial(
        _fused_cnn_kernel,
        window_sizes=tuple(window_sizes),
        compute_dtype=compute_dtype)

    return pl.pallas_call(
        kernel,
        out_shape=jax.ShapeDtypeStruct((B, NF), jnp.float32),
        grid=grid,
        in_specs=in_specs,
        out_specs=pl.BlockSpec((bb, NF), lambda i: (i, 0)),
        compiler_params=pltpu.CompilerParams(
            dimension_semantics=("parallel",),
            # Leave headroom on v7x (64 MiB physical VMEM per TC).
            vmem_limit_bytes=48 * 1024 * 1024),
    )(x, *weights, bias)


class CNNLayersPallas:
    """JAX/Pallas port of CNNLayers with deterministic Xavier-uniform init."""

    def __init__(self, d_model, num_filter, window_sizes, dropout_p, key,
                 compute_dtype=jnp.float32):
        self.d_model = d_model
        self.num_filter = num_filter
        self.window_sizes = tuple(window_sizes)
        self.dropout_p = dropout_p          # identity at inference
        self.compute_dtype = compute_dtype  # set to jnp.bfloat16 on v6e/v7x

        self.weights = []
        keys = jax.random.split(key, len(self.window_sizes))
        for k, ws in zip(keys, self.window_sizes):
            # PyTorch Conv2d weight shape: (F, 1, ws, d_model); xavier_uniform_.
            fan_in = 1 * ws * d_model
            fan_out = num_filter * ws * d_model
            bound = (6.0 / (fan_in + fan_out)) ** 0.5
            w = jax.random.uniform(
                k, (num_filter, 1, ws, d_model),
                minval=-bound, maxval=bound, dtype=jnp.float32)
            # Reorder to im2col layout: (ws, D, F) -> flatten K -> (ws*D, F),
            # so Wflat[i*D + j, f] == W[f, 0, i, j].
            w_flat = jnp.transpose(w[:, 0, :, :], (1, 2, 0)).reshape(
                ws * d_model, num_filter)
            self.weights.append(w_flat)
        # PyTorch reference zeroes conv biases; keep one concatenated row.
        self.bias = jnp.zeros(
            (1, len(self.window_sizes) * num_filter), jnp.float32)

    def __call__(self, x_nchw):
        # x_nchw: (B, 1, S, d_model) like the PyTorch module (NCHW, C=1).
        x = x_nchw[:, 0, :, :].astype(jnp.float32)        # (B, S, D)
        B = x.shape[0]
        out = fused_conv_global_max(
            x, self.weights, self.bias, self.window_sizes,
            compute_dtype=self.compute_dtype)             # (B, nw*F)
        return out.reshape(B, len(self.window_sizes), self.num_filter)


if __name__ == "__main__":
    # Small synthetic shapes consistent with the module's forward.
    B, S, D = 2, 16, 32          # batch, sequence, d_model
    num_filter = 8
    window_sizes = (2, 3, 4)

    key = jax.random.PRNGKey(0)
    k_x, k_params = jax.random.split(key)
    x = jax.random.normal(k_x, (B, 1, S, D), dtype=jnp.float32)  # NCHW

    model = CNNLayersPallas(D, num_filter, window_sizes, dropout_p=0.1,
                            key=k_params)
    out = model(x)
    out = jax.block_until_ready(out)

    assert out.shape == (B, len(window_sizes), num_filter), out.shape
    assert jnp.all(jnp.isfinite(out))
    print("KERNEL_OK")
</pallas_src>

<mosaic_0001>
module attributes {stable_mosaic.version = 11 : i64} {
  func.func @_fused_cnn_kernel(%arg0: i32, %arg1: memref<2x16x32xf32, #tpu.memory_space<vmem>>, %arg2: memref<64x8xf32, #tpu.memory_space<vmem>>, %arg3: memref<96x8xf32, #tpu.memory_space<vmem>>, %arg4: memref<128x8xf32, #tpu.memory_space<vmem>>, %arg5: memref<1x24xf32, #tpu.memory_space<vmem>>, %arg6: memref<2x24xf32, #tpu.memory_space<vmem>>) attributes {dimension_semantics = [#tpu.dimension_semantics<parallel>], iteration_bounds = array<i64: 1>, scalar_prefetch = 0 : i64, scratch_operands = 0 : i64, tpu.core_type = #tpu.core_type<tc>, window_params = [{transform_indices = @transform_0, window_bounds = array<i64: 2, 16, 32>}, {pipeline_mode = #tpu.pipeline_mode<synchronous>, transform_indices = @transform_1, window_bounds = array<i64: 64, 8>}, {pipeline_mode = #tpu.pipeline_mode<synchronous>, transform_indices = @transform_2, window_bounds = array<i64: 96, 8>}, {pipeline_mode = #tpu.pipeline_mode<synchronous>, transform_indices = @transform_3, window_bounds = array<i64: 128, 8>}, {pipeline_mode = #tpu.pipeline_mode<synchronous>, transform_indices = @transform_4, window_bounds = array<i64: 1, 24>}, {transform_indices = @transform_5, window_bounds = array<i64: 2, 24>}]} {
    %c0 = arith.constant 0 : index
    %c0_0 = arith.constant 0 : index
    %c0_1 = arith.constant 0 : index
    %0 = vector.load %arg1[%c0, %c0_0, %c0_1] : memref<2x16x32xf32, #tpu.memory_space<vmem>>, vector<2x16x32xf32>
    %1 = vector.extract_strided_slice %0 {offsets = [0, 0, 0], sizes = [2, 15, 32], strides = [1, 1, 1]} : vector<2x16x32xf32> to vector<2x15x32xf32>
    %2 = vector.extract_strided_slice %0 {offsets = [0, 1, 0], sizes = [2, 15, 32], strides = [1, 1, 1]} : vector<2x16x32xf32> to vector<2x15x32xf32>
    %3 = tpu.concatenate %1, %2 in 2 : vector<2x15x32xf32>, vector<2x15x32xf32> -> vector<2x15x64xf32>
    %c0_2 = arith.constant 0 : index
    %c0_3 = arith.constant 0 : index
    %4 = vector.load %arg2[%c0_2, %c0_3] : memref<64x8xf32, #tpu.memory_space<vmem>>, vector<64x8xf32>
    "tpu.trace_start"() <{level = 10 : i32, message = "btk,kf->btf"}> : () -> ()
    %cst = arith.constant dense<0.000000e+00> : vector<2x15x8xf32>
    %5 = tpu.matmul %3, %4, %cst {dimension_numbers = #tpu.dot_dimension_numbers<[2], [0], [0, 1], [1], [0, 0, 0, 1, 1, 1], [], []>} : vector<2x15x64xf32>, vector<64x8xf32>, vector<2x15x8xf32> -> vector<2x15x8xf32>
    "tpu.trace_stop"() : () -> ()
    %cst_4 = arith.constant dense<0xFF800000> : vector<2x8xf32>
    %6 = vector.multi_reduction <maximumf>, %5, %cst_4 [1] : vector<2x15x8xf32> to vector<2x8xf32>
    %7 = vector.extract_strided_slice %0 {offsets = [0, 0, 0], sizes = [2, 14, 32], strides = [1, 1, 1]} : vector<2x16x32xf32> to vector<2x14x32xf32>
    %8 = vector.extract_strided_slice %0 {offsets = [0, 1, 0], sizes = [2, 14, 32], strides = [1, 1, 1]} : vector<2x16x32xf32> to vector<2x14x32xf32>
    %9 = vector.extract_strided_slice %0 {offsets = [0, 2, 0], sizes = [2, 14, 32], strides = [1, 1, 1]} : vector<2x16x32xf32> to vector<2x14x32xf32>
    %10 = tpu.concatenate %7, %8, %9 in 2 : vector<2x14x32xf32>, vector<2x14x32xf32>, vector<2x14x32xf32> -> vector<2x14x96xf32>
    %c0_5 = arith.constant 0 : index
    %c0_6 = arith.constant 0 : index
    %11 = vector.load %arg3[%c0_5, %c0_6] : memref<96x8xf32, #tpu.memory_space<vmem>>, vector<96x8xf32>
    "tpu.trace_start"() <{level = 10 : i32, message = "btk,kf->btf"}> : () -> ()
    %cst_7 = arith.constant dense<0.000000e+00> : vector<2x14x8xf32>
    %12 = tpu.matmul %10, %11, %cst_7 {dimension_numbers = #tpu.dot_dimension_numbers<[2], [0], [0, 1], [1], [0, 0, 0, 1, 1, 1], [], []>} : vector<2x14x96xf32>, vector<96x8xf32>, vector<2x14x8xf32> -> vector<2x14x8xf32>
    "tpu.trace_stop"() : () -> ()
    %cst_8 = arith.constant dense<0xFF800000> : vector<2x8xf32>
    %13 = vector.multi_reduction <maximumf>, %12, %cst_8 [1] : vector<2x14x8xf32> to vector<2x8xf32>
    %14 = vector.extract_strided_slice %0 {offsets = [0, 0, 0], sizes = [2, 13, 32], strides = [1, 1, 1]} : vector<2x16x32xf32> to vector<2x13x32xf32>
    %15 = vector.extract_strided_slice %0 {offsets = [0, 1, 0], sizes = [2, 13, 32], strides = [1, 1, 1]} : vector<2x16x32xf32> to vector<2x13x32xf32>
    %16 = vector.extract_strided_slice %0 {offsets = [0, 2, 0], sizes = [2, 13, 32], strides = [1, 1, 1]} : vector<2x16x32xf32> to vector<2x13x32xf32>
    %17 = vector.extract_strided_slice %0 {offsets = [0, 3, 0], sizes = [2, 13, 32], strides = [1, 1, 1]} : vector<2x16x32xf32> to vector<2x13x32xf32>
    %18 = tpu.concatenate %14, %15, %16, %17 in 2 : vector<2x13x32xf32>, vector<2x13x32xf32>, vector<2x13x32xf32>, vector<2x13x32xf32> -> vector<2x13x128xf32>
    %c0_9 = arith.constant 0 : index
    %c0_10 = arith.constant 0 : index
    %19 = vector.load %arg4[%c0_9, %c0_10] : memref<128x8xf32, #tpu.memory_space<vmem>>, vector<128x8xf32>
    "tpu.trace_start"() <{level = 10 : i32, message = "btk,kf->btf"}> : () -> ()
    %cst_11 = arith.constant dense<0.000000e+00> : vector<2x13x8xf32>
    %20 = tpu.matmul %18, %19, %cst_11 {dimension_numbers = #tpu.dot_dimension_numbers<[2], [0], [0, 1], [1], [0, 0, 0, 1, 1, 1], [], []>} : vector<2x13x128xf32>, vector<128x8xf32>, vector<2x13x8xf32> -> vector<2x13x8xf32>
    "tpu.trace_stop"() : () -> ()
    %cst_12 = arith.constant dense<0xFF800000> : vector<2x8xf32>
    %21 = vector.multi_reduction <maximumf>, %20, %cst_12 [1] : vector<2x13x8xf32> to vector<2x8xf32>
    %22 = tpu.concatenate %6, %13, %21 in 1 : vector<2x8xf32>, vector<2x8xf32>, vector<2x8xf32> -> vector<2x24xf32>
    %c0_13 = arith.constant 0 : index
    %c0_14 = arith.constant 0 : index
    %23 = vector.load %arg5[%c0_13, %c0_14] : memref<1x24xf32, #tpu.memory_space<vmem>>, vector<1x24xf32>
    %24 = vector.broadcast %23 : vector<1x24xf32> to vector<2x24xf32>
    %25 = arith.addf %22, %24 : vector<2x24xf32>
    %c0_15 = arith.constant 0 : index
    %c0_16 = arith.constant 0 : index
    %26 = vector.load %arg6[%c0_15, %c0_16] : memref<2x24xf32, #tpu.memory_space<vmem>>, vector<2x24xf32>
    tpu.vector_store %arg6[%c0_15, %c0_16], %25 {strides = array<i32>} : memref<2x24xf32, #tpu.memory_space<vmem>>, vector<2x24xf32>,
    return
  }
  func.func @transform_0(%arg0: i32) -> (i32, i32, i32) {
    %c0_i32 = arith.constant 0 : i32
    %c0_i32_0 = arith.constant 0 : i32
    %c0_i32_1 = arith.constant 0 : i32
    return %arg0, %c0_i32, %c0_i32_0 : i32, i32, i32
  }
  func.func @transform_1(%arg0: i32) -> (i32, i32) {
    %c0_i32 = arith.constant 0 : i32
    %c0_i32_0 = arith.constant 0 : i32
    %c0_i32_1 = arith.constant 0 : i32
    return %c0_i32, %c0_i32_0 : i32, i32
  }
  func.func @transform_2(%arg0: i32) -> (i32, i32) {
    %c0_i32 = arith.constant 0 : i32
    %c0_i32_0 = arith.constant 0 : i32
    %c0_i32_1 = arith.constant 0 : i32
    return %c0_i32, %c0_i32_0 : i32, i32
  }
  func.func @transform_3(%arg0: i32) -> (i32, i32) {
    %c0_i32 = arith.constant 0 : i32
    %c0_i32_0 = arith.constant 0 : i32
    %c0_i32_1 = arith.constant 0 : i32
    return %c0_i32, %c0_i32_0 : i32, i32
  }
  func.func @transform_4(%arg0: i32) -> (i32, i32) {
    %c0_i32 = arith.constant 0 : i32
    %c0_i32_0 = arith.constant 0 : i32
    %c0_i32_1 = arith.constant 0 : i32
    return %c0_i32, %c0_i32_0 : i32, i32
  }
  func.func @transform_5(%arg0: i32) -> (i32, i32) {
    %c0_i32 = arith.constant 0 : i32
    %c0_i32_0 = arith.constant 0 : i32
    return %arg0, %c0_i32 : i32, i32
  }
}

</mosaic_0001>

<bundles_post_ra>
// kernel: tpu_custom_call.1
= control target key start
LH: loop header
LB: loop body
LE: loop exit
PB: predicated region body
PF: predicated region fallthrough
CT: control target
= control target key end

     0   :  { %vm29_vm0 = vcmask 1046528   ;;  %vm265_vm1 = vcmask 1045504   ;;  %s759_s26 = smov 32   ;;  %s1013_s0 = inlined_call_operand.vmem [shape: f32[2,16,32], index: 0, kind: input, shape index: {}]   ;;  %s1014_s1 = inlined_call_operand.vmem [shape: f32[64,8], index: 1, kind: input, shape index: {}]   ;;  %s1015_s2 = inlined_call_operand.vmem [shape: f32[96,8], index: 2, kind: input, shape index: {}]   ;;  %s1016_s3 = inlined_call_operand.vmem [shape: f32[128,8], index: 3, kind: input, shape index: {}]   ;;  %s1017_s4 = inlined_call_operand.vmem [shape: f32[1,24], index: 4, kind: input, shape index: {}]   ;;  %s1018_s5 = inlined_call_operand.hbm [shape: f32[2,24], index: 5, kind: output, shape index: {}]  }
   0x1   :  { %v798_v0 = vld [vmem:[%s1013_s0 + $0x10] sm:$0xff]  ;;  %v803_v1 = vld [vmem:[%s1013_s0 + $0x18] sm:$0xff]  ;;  %v21_v2 = vld [vmem:[%s1013_s0] sm:$0xff] }
   0x2   :  { %v33_v3 = vrot.slane %v798_v0, 1  ;;  %v34_v4 = vrot.slane %v803_v1, 1  ;;  %v813_v5 = vld [vmem:[%s1013_s0 + $0x8] sm:$0xff]  ;;  %v30_v6 = vrot.slane %v21_v2, 1  ;;  %v266_v7 = vrot.slane %v21_v2, 2 }
   0x3   :  { %v31_v8 = vrot.slane %v813_v5, 1  ;;  %v267_v9 = vrot.slane %v813_v5, 2 }
   0x4   :  { %v35_v10 = vsel %vm29_vm0, %v33_v3, %v34_v4 }
   0x5   :  { %40 = vrot.lane.b32.xlu1 %v35_v10, %s759_s26  ;;  %v32_v11 = vsel %vm29_vm0, %v30_v6, %v31_v8  ;;  %v268_v12 = vsel %vm265_vm1, %v266_v7, %v267_v9 }
   0x6   :  { %10 = vsyncpa [#allocation3], 0  ;;  %36 = vrot.lane.b32.xlu0 %v32_v11, %s759_s26  ;;  %s760_s27 = smov 64   ;;  %v270_v13 = vrot.slane %v803_v1, 2  ;;  %v269_v14 = vrot.slane %v798_v0, 2  ;;  %v440_v15 = vrot.slane %v813_v5, 3 }
   0x7   :  { %272 = vrot.lane.b32.xlu2 %v268_v12, %s760_s27  ;;  %v439_v16 = vrot.slane %v21_v2, 3  ;;  %vm438_vm2 = vcmask 1044480   ;;  %v442_v19 = vrot.slane %v798_v0, 3  ;;  %v443_v20 = vrot.slane %v803_v1, 3  ;;  %s761_s0 = smov 96   ;;  %v60_v22 = vld [vmem:[%s1014_s1 + $0x38] sm:$0xff] }
   0x8   :  { %v271_v17 = vsel %vm265_vm1, %v269_v14, %v270_v13  ;;  %v59_v23 = vld [vmem:[%s1014_s1 + $0x30] sm:$0xff]  ;;  %149 = vmatpush.msra.mxu0 %v60_v22  ;;  %v58_v24 = vld [vmem:[%s1014_s1 + $0x28] sm:$0xff]  ;;  %v57_v25 = vld [vmem:[%s1014_s1 + $0x20] sm:$0xff]  ;;  %vm48_vm3 = vcmask 261120   ;;  %vm132_vm4 = vcmask 523264   ;;  %vm339_vm5 = vcmask 785408  }
   0x9   :  { %v441_v18 = vsel %vm438_vm2, %v439_v16, %v440_v15  ;;  %v444_v21 = vsel %vm438_vm2, %v442_v19, %v443_v20  ;;  %v56_v26 = vld [vmem:[%s1014_s1 + $0x18] sm:$0xff]  ;;  %v55_v27 = vld [vmem:[%s1014_s1 + $0x10] sm:$0xff]  ;;  %v54_v32 = vld [vmem:[%s1014_s1 + $0x8] sm:$0xff]  ;;  %vm420_vm6 = vcmask 62464   ;;  %vm245_vm7 = vcmask 64512   ;;  %s764_s21 = smov [#allocation2]  }
   0xa   :  { %150 = vmatpush.msra.mxu0 %v59_v23  ;;  %v53_v38 = vld [vmem:[%s1014_s1] sm:$0xff]  ;;  %vm661_vm8 = vcmask 1041409   ;;  %vm641_vm9 = vcmask 61440   ;;  %s763_s1 = smov 16   ;;  %vm247_vm10 = vcmask 63488   ;;  %vm677_vm11 = vcmask 130048  }
   0xb   :  { %s691_s22 = sshll.u32 %s764_s21, 4  ;;  %s693_s25 = sshll.u32 %s1018_s5, 4  ;;  %vm684_vm12 = vcmask 189440   ;;  %s692_s22 = int_to_ptr.vmem [resolvable:$true] %s691_s22  ;;  %s694_s25 = int_to_ptr.hbm [resolvable:$true] %s693_s25 }
   0xc   :  { %151 = vmatpush.msra.mxu0 %v58_v24 }
   0xd   :  { %42 = vrot.lane.b32.xlu1 %v34_v4, %s759_s26 }
   0xe   :  { %38 = vrot.lane.b32.xlu0 %v31_v8, %s759_s26  ;;  %152 = vmatpush.msra.mxu0 %v57_v25 }
   0xf   :  { %274 = vrot.lane.b32.xlu2 %v267_v9, %s760_s27 }
  0x10   :  { %153 = vmatpush.msra.mxu0 %v56_v26 }
  0x12   :  { %154 = vmatpush.msra.mxu0 %v55_v27 }
  0x14   :  { %155 = vmatpush.msra.mxu0 %v54_v32  ;;  %v295_v32 = vld [vmem:[%s1015_s2 + $0x38] sm:$0xff] }
  0x15   :  { %278 = vrot.lane.b32.xlu1 %v270_v13, %s760_s27 }
  0x16   :  { %276 = vrot.lane.b32.xlu0 %v271_v17, %s760_s27  ;;  %156 = vmatpush.msra.mxu0 %v53_v38  ;;  %v293_v38 = vld [vmem:[%s1015_s2 + $0x28] sm:$0xff] }
  0x17   :  { %445 = vrot.lane.b32.xlu2 %v441_v18, %s761_s0 }
  0x1d   :  { %449 = vrot.lane.b32.xlu1 %v444_v21, %s761_s0  ;;  %v298_v21 = vld [vmem:[%s1015_s2 + $0x50] sm:$0xff] }
  0x1e   :  { %447 = vrot.lane.b32.xlu0 %v440_v15, %s761_s0 }
  0x1f   :  { %451 = vrot.lane.b32.xlu2 %v443_v20, %s761_s0  ;;  %v299_v20 = vld [vmem:[%s1015_s2 + $0x58] sm:$0xff] }
  0x20   :  { %352 = vmatpush.msra.mxu1 %v299_v20 }
  0x22   :  { %353 = vmatpush.msra.mxu1 %v298_v21 }
  0x61   :  { %v273_v30 = vpop.permute.xlu2 %272 }
  0x69   :  { %v275_v45 = vpop.permute.xlu2 %274 }
  0x77   :  { %v41_v28 = vpop.permute.xlu1 %40 }
  0x78   :  { %v37_v29 = vpop.permute.xlu0 %36  ;;  %v51_v49 = vsel %vm48_vm3, %v798_v0, %v41_v28 }
  0x79   :  { %v49_v31 = vsel %vm48_vm3, %v21_v2, %v37_v29  ;;  %v78_v60 = vrot.slane %v51_v49, 1  ;;  %v79_v61 = vrot.slane %v51_v49, 2  ;;  %v80_v63 = vrot.slane %v51_v49, 3 }
  0x7a   :  { %v65_v33 = vrot.slane %v49_v31, 1  ;;  %v66_v34 = vrot.slane %v49_v31, 2  ;;  %v67_v35 = vrot.slane %v49_v31, 3  ;;  %91 = vst [vmem:[#allocation1] ss:$9 sm:$0xff] %v49_v31  ;;  %v68_v36 = vrot.slane %v49_v31, 4 }
  0x7b   :  { %v847_v37 = vsel %vm132_vm4, %v49_v31, %v273_v30  ;;  %v69_v39 = vrot.slane %v49_v31, 5  ;;  %v70_v40 = vrot.slane %v49_v31, 6  ;;  %v71_v41 = vrot.slane %v49_v31, 7  ;;  %v297_v30 = vld [vmem:[%s1015_s2 + $0x48] sm:$0xff]  ;;  %v296_v31 = vld [vmem:[%s1015_s2 + $0x40] sm:$0xff] }
  0x7c   :  { %93 = vst [vmem:[#allocation1 + $0x1] ss:$9 sm:$0xff] %v65_v33  ;;  %v81_v0 = vrot.slane %v51_v49, 4  ;;  %v83_v2 = vrot.slane %v51_v49, 6  ;;  %v84_v3 = vrot.slane %v51_v49, 7  ;;  %354 = vmatpush.msra.mxu1 %v297_v30  ;;  %v294_v33 = vld [vmem:[%s1015_s2 + $0x30] sm:$0xff] }
  0x7d   :  { %95 = vst [vmem:[#allocation1 + $0x2] ss:$9 sm:$0xff] %v66_v34  ;;  %v468_v30 = vld [vmem:[%s1016_s3 + $0x38] sm:$0xff] }
  0x7e   :  { %97 = vst [vmem:[#allocation1 + $0x3] ss:$9 sm:$0xff] %v67_v35  ;;  %355 = vmatpush.msra.mxu1 %v296_v31 }
  0x7f   :  { %v43_v42 = vpop.permute.xlu1 %42  ;;  %99 = vst [vmem:[#allocation1 + $0x4] ss:$9 sm:$0xff] %v68_v36 }
  0x80   :  { %v39_v43 = vpop.permute.xlu0 %38  ;;  %101 = vst [vmem:[#allocation1 + $0x5] ss:$9 sm:$0xff] %v69_v39  ;;  %v52_v47 = vsel %vm48_vm3, %v803_v1, %v43_v42  ;;  %v82_v1 = vrot.slane %v51_v49, 5  ;;  %356 = vmatpush.msra.mxu1 %v295_v32 }
  0x81   :  { %103 = vst [vmem:[#allocation1 + $0x6] ss:$9 sm:$0xff] %v70_v40  ;;  %v50_v44 = vsel %vm48_vm3, %v813_v5, %v39_v43  ;;  %v85_v4 = vrot.slane %v52_v47, 1  ;;  %v86_v5 = vrot.slane %v52_v47, 2  ;;  %v87_v7 = vrot.slane %v52_v47, 3  ;;  %v292_v43 = vld [vmem:[%s1015_s2 + $0x20] sm:$0xff] }
  0x82   :  { %105 = vst [vmem:[#allocation1 + $0x7] ss:$9 sm:$0xff] %v71_v41  ;;  %v855_v46 = vsel %vm132_vm4, %v50_v44, %v275_v45  ;;  %v72_v52 = vrot.slane %v50_v44, 1  ;;  %v73_v55 = vrot.slane %v50_v44, 2  ;;  %v74_v56 = vrot.slane %v50_v44, 3  ;;  %357 = vmatpush.msra.mxu1 %v294_v33 }
  0x83   :  { %v75_v57 = vrot.slane %v50_v44, 4  ;;  %v76_v58 = vrot.slane %v50_v44, 5  ;;  %v77_v59 = vrot.slane %v50_v44, 6  ;;  %v88_v8 = vrot.slane %v52_v47, 4 }
  0x84   :  { %v89_v9 = vrot.slane %v52_v47, 5  ;;  %v90_v10 = vrot.slane %v52_v47, 6  ;;  %358 = vmatpush.msra.mxu1 %v293_v38 }
  0x86   :  { %359 = vmatpush.msra.mxu1 %v292_v43 }
  0x87   :  { %v279_v48 = vpop.permute.xlu1 %278 }
  0x88   :  { %v862_v50 = vsel %vm132_vm4, %v52_v47, %v279_v48  ;;  %v277_v51 = vpop.permute.xlu0 %276  ;;  %v290_v48 = vld [vmem:[%s1015_s2 + $0x10] sm:$0xff] }
  0x89   :  { %v865_v53 = vsel %vm132_vm4, %v51_v49, %v277_v51  ;;  %v106_v54 = vld [vmem:[#allocation1] sm:$0xff] }
  0x8a   :  { %114 = vst [vmem:[#allocation1 + $0x7] ss:$9 sm:$0xff] %v51_v49  ;;  %702 = vmatmul.msk.f32.vlgmr.msra.gmra.mxu0 %vm132_vm4, %v106_v54  ;;  %v289_v49 = vld [vmem:[%s1015_s2 + $0x8] sm:$0xff]  ;;  %v288_v51 = vld [vmem:[%s1015_s2] sm:$0xff] }
  0x8b   :  { %107 = vst [vmem:[#allocation1] ss:$9 sm:$0xff] %v50_v44 }
  0x8c   :  { %108 = vst [vmem:[#allocation1 + $0x1] ss:$9 sm:$0xff] %v72_v52 }
  0x8d   :  { %109 = vst [vmem:[#allocation1 + $0x2] ss:$9 sm:$0xff] %v73_v55 }
  0x8e   :  { %110 = vst [vmem:[#allocation1 + $0x3] ss:$9 sm:$0xff] %v74_v56 }
  0x8f   :  { %111 = vst [vmem:[#allocation1 + $0x4] ss:$9 sm:$0xff] %v75_v57 }
  0x90   :  { %112 = vst [vmem:[#allocation1 + $0x5] ss:$9 sm:$0xff] %v76_v58 }
  0x91   :  { %113 = vst [vmem:[#allocation1 + $0x6] ss:$9 sm:$0xff] %v77_v59 }
  0x98   :  { %v115_v62 = vld [vmem:[#allocation1] sm:$0xff] }
  0x99   :  { %116 = vst [vmem:[#allocation1] ss:$9 sm:$0xff] %v78_v60  ;;  %703 = vmatmul.msk.f32.gmra.mxu0 %vm132_vm4, %v115_v62  ;;  %v308_v62 = vrot.slane %v855_v46, 4 }
  0x9a   :  { %117 = vst [vmem:[#allocation1 + $0x1] ss:$9 sm:$0xff] %v79_v61  ;;  %v307_v61 = vrot.slane %v855_v46, 2 }
  0x9b   :  { %118 = vst [vmem:[#allocation1 + $0x2] ss:$9 sm:$0xff] %v80_v63  ;;  %v304_v63 = vrot.slane %v847_v37, 2 }
  0x9c   :  { %119 = vst [vmem:[#allocation1 + $0x3] ss:$9 sm:$0xff] %v81_v0 }
  0x9d   :  { %120 = vst [vmem:[#allocation1 + $0x4] ss:$9 sm:$0xff] %v82_v1  ;;  %v305_v1 = vrot.slane %v847_v37, 4 }
  0x9e   :  { %121 = vst [vmem:[#allocation1 + $0x5] ss:$9 sm:$0xff] %v83_v2  ;;  %v306_v2 = vrot.slane %v847_v37, 6 }
  0x9f   :  { %122 = vst [vmem:[#allocation1 + $0x6] ss:$9 sm:$0xff] %v84_v3  ;;  %v312_v3 = vrot.slane %v862_v50, 2 }
  0xa0   :  { %123 = vst [vmem:[#allocation1 + $0x7] ss:$9 sm:$0xff] %v52_v47  ;;  %v291_v47 = vld [vmem:[%s1015_s2 + $0x18] sm:$0xff] }
  0xa1   :  { %360 = vmatpush.msra.mxu1 %v291_v47 }
  0xa3   :  { %361 = vmatpush.msra.mxu1 %v290_v48 }
  0xa5   :  { %362 = vmatpush.msra.mxu1 %v289_v49 }
  0xa7   :  { %v124_v6 = vld [vmem:[#allocation1] sm:$0xff]  ;;  %363 = vmatpush.msra.mxu1 %v288_v51  ;;  %v463_v51 = vld [vmem:[%s1016_s3 + $0x10] sm:$0xff] }
  0xa8   :  { %125 = vst [vmem:[#allocation1] ss:$9 sm:$0xff] %v85_v4  ;;  %704 = vmatmul.msk.f32.gmra.mxu0 %vm132_vm4, %v124_v6  ;;  %v313_v4 = vrot.slane %v862_v50, 4  ;;  %v309_v6 = vrot.slane %v865_v53, 2 }
  0xa9   :  { %126 = vst [vmem:[#allocation1 + $0x1] ss:$9 sm:$0xff] %v86_v5 }
  0xaa   :  { %127 = vst [vmem:[#allocation1 + $0x2] ss:$9 sm:$0xff] %v87_v7  ;;  %v310_v7 = vrot.slane %v865_v53, 4 }
  0xab   :  { %128 = vst [vmem:[#allocation1 + $0x3] ss:$9 sm:$0xff] %v88_v8 }
  0xac   :  { %129 = vst [vmem:[#allocation1 + $0x4] ss:$9 sm:$0xff] %v89_v9  ;;  %v311_v9 = vrot.slane %v865_v53, 6 }
  0xad   :  { %130 = vst [vmem:[#allocation1 + $0x5] ss:$9 sm:$0xff] %v90_v10 }
  0xb4   :  { %v131_v11 = vld [vmem:[#allocation1] sm:$0xff] }
  0xb5   :  { %705 = vmatmul.msk.f32.gmra.mxu0 %vm132_vm4, %v131_v11 }
 0x107   :  { %v158_v12 = vpop.f32.mrf.mxu0 }
 0x108   :  { %v174_v13 = vrot.slane %v158_v12, 1  ;;  %v175_v14 = vrot.slane %v158_v12, 2  ;;  %v176_v15 = vrot.slane %v158_v12, 3  ;;  %200 = vst [vmem:[#allocation1] ss:$9 sm:$0xff] %v158_v12  ;;  %v177_v16 = vrot.slane %v158_v12, 4 }
 0x109   :  { %v178_v17 = vrot.slane %v158_v12, 5  ;;  %v179_v18 = vrot.slane %v158_v12, 6  ;;  %v180_v19 = vrot.slane %v158_v12, 7  ;;  %v476_v12 = vld [vmem:[%s1016_s3 + $0x78] sm:$0xff] }
 0x10a   :  { %202 = vst [vmem:[#allocation1 + $0x1] ss:$9 sm:$0xff] %v174_v13  ;;  %v475_v13 = vld [vmem:[%s1016_s3 + $0x70] sm:$0xff]  ;;  %544 = vmatpush.msra.mxu2 %v476_v12  ;;  %710 = vmatpush.msra.mxu3 %v476_v12 }
 0x10b   :  { %204 = vst [vmem:[#allocation1 + $0x2] ss:$9 sm:$0xff] %v175_v14  ;;  %v474_v14 = vld [vmem:[%s1016_s3 + $0x68] sm:$0xff] }
 0x10c   :  { %206 = vst [vmem:[#allocation1 + $0x3] ss:$9 sm:$0xff] %v176_v15  ;;  %545 = vmatpush.msra.mxu2 %v475_v13  ;;  %711 = vmatpush.msra.mxu3 %v475_v13  ;;  %v473_v15 = vld [vmem:[%s1016_s3 + $0x60] sm:$0xff] }
 0x10d   :  { %208 = vst [vmem:[#allocation1 + $0x4] ss:$9 sm:$0xff] %v177_v16  ;;  %v472_v16 = vld [vmem:[%s1016_s3 + $0x58] sm:$0xff] }
 0x10e   :  { %210 = vst [vmem:[#allocation1 + $0x5] ss:$9 sm:$0xff] %v178_v17  ;;  %546 = vmatpush.msra.mxu2 %v474_v14  ;;  %712 = vmatpush.msra.mxu3 %v474_v14  ;;  %v471_v17 = vld [vmem:[%s1016_s3 + $0x50] sm:$0xff] }
 0x10f   :  { %212 = vst [vmem:[#allocation1 + $0x6] ss:$9 sm:$0xff] %v179_v18 }
 0x110   :  { %214 = vst [vmem:[#allocation1 + $0x7] ss:$9 sm:$0xff] %v180_v19  ;;  %547 = vmatpush.msra.mxu2 %v473_v15  ;;  %713 = vmatpush.msra.mxu3 %v473_v15 }
 0x112   :  { %548 = vmatpush.msra.mxu2 %v472_v16  ;;  %714 = vmatpush.msra.mxu3 %v472_v16  ;;  %v450_v16 = vpop.permute.xlu1 %449 }
 0x114   :  { %549 = vmatpush.msra.mxu2 %v471_v17  ;;  %715 = vmatpush.msra.mxu3 %v471_v17 }
 0x116   :  { %v161_v22 = vpop.f32.mrf.mxu0 }
 0x117   :  { %v877_v23 = vld [vmem:[#allocation1] sm:$0xff]  ;;  %v181_v24 = vrot.slane %v161_v22, 1  ;;  %v182_v25 = vrot.slane %v161_v22, 2  ;;  %v183_v26 = vrot.slane %v161_v22, 3  ;;  %v184_v27 = vrot.slane %v161_v22, 4 }
 0x118   :  { %216 = vst [vmem:[#allocation1] ss:$9 sm:$0xff] %v161_v22  ;;  %v185_v28 = vrot.slane %v161_v22, 5  ;;  %v186_v29 = vrot.slane %v161_v22, 6  ;;  %v187_v34 = vrot.slane %v161_v22, 7 }
 0x119   :  { %217 = vst [vmem:[#allocation1 + $0x1] ss:$9 sm:$0xff] %v181_v24 }
 0x11a   :  { %218 = vst [vmem:[#allocation1 + $0x2] ss:$9 sm:$0xff] %v182_v25 }
 0x11b   :  { %219 = vst [vmem:[#allocation1 + $0x3] ss:$9 sm:$0xff] %v183_v26 }
 0x11c   :  { %220 = vst [vmem:[#allocation1 + $0x4] ss:$9 sm:$0xff] %v184_v27  ;;  %v470_v27 = vld [vmem:[%s1016_s3 + $0x48] sm:$0xff] }
 0x11d   :  { %221 = vst [vmem:[#allocation1 + $0x5] ss:$9 sm:$0xff] %v185_v28  ;;  %550 = vmatpush.msra.mxu2 %v470_v27  ;;  %716 = vmatpush.msra.mxu3 %v470_v27 }
 0x11e   :  { %222 = vst [vmem:[#allocation1 + $0x6] ss:$9 sm:$0xff] %v186_v29  ;;  %v469_v29 = vld [vmem:[%s1016_s3 + $0x40] sm:$0xff] }
 0x11f   :  { %551 = vmatpush.msra.mxu2 %v469_v29  ;;  %717 = vmatpush.msra.mxu3 %v469_v29 }
 0x121   :  { %552 = vmatpush.msra.mxu2 %v468_v30  ;;  %718 = vmatpush.msra.mxu3 %v468_v30 }
 0x125   :  { %v891_v35 = vld [vmem:[#allocation1] sm:$0xff]  ;;  %v164_v36 = vpop.f32.mrf.mxu0 }
 0x126   :  { %224 = vst [vmem:[#allocation1] ss:$9 sm:$0xff] %v187_v34  ;;  %v188_v39 = vrot.slane %v164_v36, 1  ;;  %v189_v40 = vrot.slane %v164_v36, 2  ;;  %v190_v41 = vrot.slane %v164_v36, 3  ;;  %v191_v42 = vrot.slane %v164_v36, 4 }
 0x127   :  { %225 = vst [vmem:[#allocation1 + $0x1] ss:$9 sm:$0xff] %v164_v36  ;;  %v192_v44 = vrot.slane %v164_v36, 5  ;;  %v193_v45 = vrot.slane %v164_v36, 6  ;;  %v194_v54 = vrot.slane %v164_v36, 7  ;;  %v467_v36 = vld [vmem:[%s1016_s3 + $0x30] sm:$0xff] }
 0x128   :  { %226 = vst [vmem:[#allocation1 + $0x2] ss:$9 sm:$0xff] %v188_v39  ;;  %553 = vmatpush.msra.mxu2 %v467_v36  ;;  %719 = vmatpush.msra.mxu3 %v467_v36  ;;  %v466_v39 = vld [vmem:[%s1016_s3 + $0x28] sm:$0xff] }
 0x129   :  { %227 = vst [vmem:[#allocation1 + $0x3] ss:$9 sm:$0xff] %v189_v40  ;;  %v446_v40 = vpop.permute.xlu2 %445 }
 0x12a   :  { %228 = vst [vmem:[#allocation1 + $0x4] ss:$9 sm:$0xff] %v190_v41  ;;  %554 = vmatpush.msra.mxu2 %v466_v39  ;;  %720 = vmatpush.msra.mxu3 %v466_v39  ;;  %v465_v41 = vld [vmem:[%s1016_s3 + $0x20] sm:$0xff]  ;;  %v457_v43 = vsel %vm339_vm5, %v847_v37, %v446_v40 }
 0x12b   :  { %229 = vst [vmem:[#allocation1 + $0x5] ss:$9 sm:$0xff] %v191_v42 }
 0x12c   :  { %230 = vst [vmem:[#allocation1 + $0x6] ss:$9 sm:$0xff] %v192_v44  ;;  %555 = vmatpush.msra.mxu2 %v465_v41  ;;  %721 = vmatpush.msra.mxu3 %v465_v41  ;;  %v464_v44 = vld [vmem:[%s1016_s3 + $0x18] sm:$0xff] }
 0x12d   :  { %231 = vst [vmem:[#allocation1 + $0x7] ss:$9 sm:$0xff] %v193_v45 }
 0x12e   :  { %556 = vmatpush.msra.mxu2 %v464_v44  ;;  %722 = vmatpush.msra.mxu3 %v464_v44 }
 0x130   :  { %557 = vmatpush.msra.mxu2 %v463_v51  ;;  %723 = vmatpush.msra.mxu3 %v463_v51 }
 0x132   :  { %v167_v52 = vpop.f32.mrf.mxu0 }
 0x133   :  { %v195_v55 = vrot.slane %v167_v52, 1  ;;  %v196_v57 = vrot.slane %v167_v52, 2  ;;  %v197_v58 = vrot.slane %v167_v52, 3  ;;  %v198_v59 = vrot.slane %v167_v52, 4 }
 0x134   :  { %v911_v56 = vld [vmem:[#allocation1] sm:$0xff]  ;;  %v199_v60 = vrot.slane %v167_v52, 5 }
 0x135   :  { %233 = vst [vmem:[#allocation1] ss:$9 sm:$0xff] %v194_v54  ;;  %v462_v54 = vld [vmem:[%s1016_s3 + $0x8] sm:$0xff] }
 0x136   :  { %234 = vst [vmem:[#allocation1 + $0x1] ss:$9 sm:$0xff] %v167_v52  ;;  %v484_v52 = vrot.slane %v457_v43, 4  ;;  %558 = vmatpush.msra.mxu2 %v462_v54  ;;  %724 = vmatpush.msra.mxu3 %v462_v54 }
 0x137   :  { %235 = vst [vmem:[#allocation1 + $0x2] ss:$9 sm:$0xff] %v195_v55 }
 0x138   :  { %236 = vst [vmem:[#allocation1 + $0x3] ss:$9 sm:$0xff] %v196_v57  ;;  %v461_v57 = vld [vmem:[%s1016_s3] sm:$0xff]  ;;  %s762_s3 = smov 8  }
 0x139   :  { %237 = vst [vmem:[#allocation1 + $0x4] ss:$9 sm:$0xff] %v197_v58  ;;  %559 = vmatpush.msra.mxu2 %v461_v57  ;;  %725 = vmatpush.msra.mxu3 %v461_v57 }
 0x13a   :  { %238 = vst [vmem:[#allocation1 + $0x5] ss:$9 sm:$0xff] %v198_v59  ;;  %v481_v59 = vrot.slane %v457_v43, 1 }
 0x13b   :  { %239 = vst [vmem:[#allocation1 + $0x6] ss:$9 sm:$0xff] %v199_v60 }
 0x13c   :  { %322 = vst [vmem:[#allocation1 + $0x20] ss:$4 sm:$0xff] %v855_v46 }
 0x13d   :  { %324 = vst [vmem:[#allocation1 + $0x21] ss:$4 sm:$0xff] %v307_v61  ;;  %v482_v61 = vrot.slane %v457_v43, 2 }
 0x13e   :  { %326 = vst [vmem:[#allocation1 + $0x22] ss:$4 sm:$0xff] %v308_v62 }
 0x13f   :  { %328 = vst [vmem:[#allocation1 + $0x23] ss:$4 sm:$0xff] %v865_v53 }
 0x142   :  { %v918_v0 = vld [vmem:[#allocation1] sm:$0xff] }
 0x143   :  { %314 = vst [vmem:[#allocation1] ss:$4 sm:$0xff] %v847_v37 }
 0x144   :  { %316 = vst [vmem:[#allocation1 + $0x1] ss:$4 sm:$0xff] %v304_v63 }
 0x145   :  { %318 = vst [vmem:[#allocation1 + $0x2] ss:$4 sm:$0xff] %v305_v1  ;;  %v483_v1 = vrot.slane %v457_v43, 3 }
 0x146   :  { %320 = vst [vmem:[#allocation1 + $0x3] ss:$4 sm:$0xff] %v306_v2  ;;  %v330_v5 = vld.sshfl [vmem:[#allocation1 + $0x20] sm:$0xff pattern:$0x73625140] }
 0x147   :  { %335 = vst [vmem:[#allocation1 + $0x20] ss:$4 sm:$0xff] %v312_v3 }
 0x148   :  { %336 = vst [vmem:[#allocation1 + $0x21] ss:$4 sm:$0xff] %v313_v4  ;;  %v485_v4 = vrot.slane %v457_v43, 5 }
 0x14d   :  { %v329_v8 = vld.sshfl [vmem:[#allocation1] sm:$0xff pattern:$0x73625140] }
 0x14e   :  { %331 = vst [vmem:[#allocation1] ss:$4 sm:$0xff] %v309_v6  ;;  %706 = vmatmul.msk.f32.vlgmr.msra.gmra.mxu1 %vm339_vm5, %v329_v8 }
 0x14f   :  { %332 = vst [vmem:[#allocation1 + $0x1] ss:$4 sm:$0xff] %v310_v7  ;;  %v338_v11 = vld.sshfl [vmem:[#allocation1 + $0x20] sm:$0xff pattern:$0x73625140]  ;;  %v487_v7 = vrot.slane %v457_v43, 7 }
 0x150   :  { %333 = vst [vmem:[#allocation1 + $0x2] ss:$4 sm:$0xff] %v311_v9 }
 0x151   :  { %334 = vst [vmem:[#allocation1 + $0x3] ss:$4 sm:$0xff] %v862_v50 }
 0x156   :  { %707 = vmatmul.msk.f32.gmra.mxu1 %vm339_vm5, %v330_v5  ;;  %v486_v5 = vrot.slane %v457_v43, 6 }
 0x158   :  { %v337_v10 = vld.sshfl [vmem:[#allocation1] sm:$0xff pattern:$0x73625140] }
 0x15e   :  { %708 = vmatmul.msk.f32.gmra.mxu1 %vm339_vm5, %v337_v10  ;;  %v448_v10 = vpop.permute.xlu0 %447 }
 0x15f   :  { %v458_v14 = vsel %vm339_vm5, %v855_v46, %v448_v10 }
 0x160   :  { %v488_v17 = vrot.slane %v458_v14, 1 }
 0x166   :  { %709 = vmatmul.msk.f32.gmra.mxu1 %vm339_vm5, %v338_v11 }
 0x1cb   :  { %v365_v18 = vpop.f32.mrf.mxu1 }
 0x1cc   :  { %v381_v19 = vrot.slane %v365_v18, 2  ;;  %v382_v20 = vrot.slane %v365_v18, 4  ;;  %v383_v21 = vrot.slane %v365_v18, 6  ;;  %391 = vst [vmem:[#allocation1] ss:$4 sm:$0xff] %v365_v18 }
 0x1ce   :  { %393 = vst [vmem:[#allocation1 + $0x1] ss:$4 sm:$0xff] %v381_v19 }
 0x1cf   :  { %395 = vst [vmem:[#allocation1 + $0x2] ss:$4 sm:$0xff] %v382_v20 }
 0x1d0   :  { %397 = vst [vmem:[#allocation1 + $0x3] ss:$4 sm:$0xff] %v383_v21  ;;  %v489_v21 = vrot.slane %v458_v14, 2 }
 0x1d3   :  { %v368_v22 = vpop.f32.mrf.mxu1 }
 0x1d4   :  { %v384_v24 = vrot.slane %v368_v22, 2  ;;  %v385_v25 = vrot.slane %v368_v22, 4  ;;  %v386_v26 = vrot.slane %v368_v22, 6  ;;  %399 = vst [vmem:[#allocation1 + $0x20] ss:$4 sm:$0xff] %v368_v22  ;;  %v459_v22 = vsel %vm339_vm5, %v865_v53, %v450_v16 }
 0x1d5   :  { %v492_v46 = vrot.slane %v459_v22, 1  ;;  %v493_v27 = vrot.slane %v459_v22, 2  ;;  %v498_v29 = vrot.slane %v459_v22, 7  ;;  %v494_v30 = vrot.slane %v459_v22, 3 }
 0x1d6   :  { %403 = vst [vmem:[#allocation1 + $0x22] ss:$4 sm:$0xff] %v385_v25  ;;  %v495_v53 = vrot.slane %v459_v22, 4 }
 0x1d7   :  { %v404_v28 = vld.sshfl [vmem:[#allocation1] sm:$0xff pattern:$0x73625140]  ;;  %401 = vst [vmem:[#allocation1 + $0x21] ss:$4 sm:$0xff] %v384_v24  ;;  %v490_v24 = vrot.slane %v458_v14, 3 }
 0x1d8   :  { %406 = vst [vmem:[#allocation1] ss:$4 sm:$0xff] %v386_v26  ;;  %v419_v45 = vsel %vm245_vm7, %v404_v28, -inf  ;;  %v491_v26 = vrot.slane %v458_v14, 4  ;;  %v452_v28 = vpop.permute.xlu2 %451 }
 0x1db   :  { %v371_v31 = vpop.f32.mrf.mxu1 }
 0x1dc   :  { %v387_v32 = vrot.slane %v371_v31, 2  ;;  %v388_v33 = vrot.slane %v371_v31, 4  ;;  %v389_v34 = vrot.slane %v371_v31, 6  ;;  %407 = vst [vmem:[#allocation1 + $0x1] ss:$4 sm:$0xff] %v371_v31 }
 0x1de   :  { %v405_v38 = vld.sshfl [vmem:[#allocation1 + $0x20] sm:$0xff pattern:$0x73625140]  ;;  %408 = vst [vmem:[#allocation1 + $0x2] ss:$4 sm:$0xff] %v387_v32  ;;  %v460_v32 = vsel %vm339_vm5, %v862_v50, %v452_v28 }
 0x1df   :  { %409 = vst [vmem:[#allocation1 + $0x3] ss:$4 sm:$0xff] %v388_v33  ;;  %v421_v42 = vsel %vm420_vm6, %v405_v38, -inf  ;;  %v496_v33 = vrot.slane %v459_v22, 5  ;;  %v499_v36 = vrot.slane %v460_v32, 1  ;;  %v500_v38 = vrot.slane %v460_v32, 2 }
 0x1e0   :  { %410 = vst [vmem:[#allocation1 + $0x20] ss:$4 sm:$0xff] %v389_v34  ;;  %v422_v48 = vmax.f32 %v419_v45, %v421_v42  ;;  %v497_v34 = vrot.slane %v459_v22, 6  ;;  %v501_v39 = vrot.slane %v460_v32, 3  ;;  %v502_v40 = vrot.slane %v460_v32, 4 }
 0x1e2   :  { %v423_v55 = vrot.slane %v422_v48, 4 }
 0x1e3   :  { %v374_v47 = vpop.f32.mrf.mxu1 }
 0x1e4   :  { %v390_v49 = vrot.slane %v374_v47, 2  ;;  %411 = vst [vmem:[#allocation1 + $0x21] ss:$4 sm:$0xff] %v374_v47  ;;  %v424_v58 = vmax.f32 %v422_v48, %v423_v55 }
 0x1e6   :  { %v413_v37 = vld.sshfl [vmem:[#allocation1] sm:$0xff pattern:$0x73625140]  ;;  %412 = vst [vmem:[#allocation1 + $0x22] ss:$4 sm:$0xff] %v390_v49  ;;  %v425_v2 = vrot.slane %v424_v58, 2 }
 0x1e7   :  { %511 = vst [vmem:[#allocation1 + $0x4] ss:$9 sm:$0xff] %v484_v52  ;;  %v429_v62 = vsel %vm245_vm7, %v413_v37, -inf }
 0x1e8   :  { %v426_v8 = vmax.f32 %v424_v58, %v425_v2 }
 0x1ea   :  { %v427_v12 = vrot.slane %v426_v8, 1 }
 0x1ec   :  { %v428_v19 = vmax.f32 %v426_v8, %v427_v12 }
 0x1ed   :  { %v414_v60 = vld.sshfl [vmem:[#allocation1 + $0x20] sm:$0xff pattern:$0x73625140] }
 0x1ee   :  { %503 = vst [vmem:[#allocation1] ss:$9 sm:$0xff] %v457_v43  ;;  %v430_v63 = vsel %vm420_vm6, %v414_v60, -inf }
 0x1ef   :  { %505 = vst [vmem:[#allocation1 + $0x1] ss:$9 sm:$0xff] %v481_v59  ;;  %v431_v3 = vmax.f32 %v429_v62, %v430_v63 }
 0x1f0   :  { %507 = vst [vmem:[#allocation1 + $0x2] ss:$9 sm:$0xff] %v482_v61 }
 0x1f1   :  { %509 = vst [vmem:[#allocation1 + $0x3] ss:$9 sm:$0xff] %v483_v1  ;;  %v432_v6 = vrot.slane %v431_v3, 4 }
 0x1f2   :  { %513 = vst [vmem:[#allocation1 + $0x5] ss:$9 sm:$0xff] %v485_v4 }
 0x1f3   :  { %515 = vst [vmem:[#allocation1 + $0x6] ss:$9 sm:$0xff] %v486_v5  ;;  %v433_v9 = vmax.f32 %v431_v3, %v432_v6 }
 0x1f4   :  { %517 = vst [vmem:[#allocation1 + $0x7] ss:$9 sm:$0xff] %v487_v7 }
 0x1f5   :  { %v434_v11 = vrot.slane %v433_v9, 2 }
 0x1f7   :  { %v435_v13 = vmax.f32 %v433_v9, %v434_v11 }
 0x1f9   :  { %v436_v15 = vrot.slane %v435_v13, 1 }
 0x1fb   :  { %v518_v18 = vld [vmem:[#allocation1] sm:$0xff]  ;;  %v437_v20 = vmax.f32 %v435_v13, %v436_v15 }
 0x1fc   :  { %519 = vst [vmem:[#allocation1] ss:$9 sm:$0xff] %v458_v14  ;;  %560 = vmatmul.f32.vlgmr.msra.gmra.mxu2 %v518_v18 }
 0x1fd   :  { %520 = vst [vmem:[#allocation1 + $0x1] ss:$9 sm:$0xff] %v488_v17  ;;  %v666_v25 = vsel %vm661_vm8, %v437_v20, %v428_v19 }
 0x1fe   :  { %521 = vst [vmem:[#allocation1 + $0x2] ss:$9 sm:$0xff] %v489_v21  ;;  %667 = vrot.lane.b32.xlu0 %v666_v25, %s762_s3 }
 0x1ff   :  { %522 = vst [vmem:[#allocation1 + $0x3] ss:$9 sm:$0xff] %v490_v24 }
 0x200   :  { %523 = vst [vmem:[#allocation1 + $0x4] ss:$9 sm:$0xff] %v491_v26 }
 0x201   :  { %524 = vst [vmem:[#allocation1 + $0x5] ss:$9 sm:$0xff] %v459_v22 }
 0x202   :  { %525 = vst [vmem:[#allocation1 + $0x6] ss:$9 sm:$0xff] %v492_v46 }
 0x203   :  { %526 = vst [vmem:[#allocation1 + $0x7] ss:$9 sm:$0xff] %v493_v27 }
 0x20a   :  { %v527_v31 = vld [vmem:[#allocation1] sm:$0xff] }
 0x20b   :  { %532 = vst [vmem:[#allocation1 + $0x4] ss:$9 sm:$0xff] %v498_v29  ;;  %563 = vmatmul.f32.vlgmr.msra.gmra.mxu3 %v527_v31  ;;  %v257_v31 = vsel %vm247_vm10, %v918_v0, -inf }
 0x20c   :  { %528 = vst [vmem:[#allocation1] ss:$9 sm:$0xff] %v494_v30 }
 0x20d   :  { %529 = vst [vmem:[#allocation1 + $0x1] ss:$9 sm:$0xff] %v495_v53  ;;  %v248_v53 = vsel %vm247_vm10, %v891_v35, -inf }
 0x20e   :  { %530 = vst [vmem:[#allocation1 + $0x2] ss:$9 sm:$0xff] %v496_v33 }
 0x20f   :  { %531 = vst [vmem:[#allocation1 + $0x3] ss:$9 sm:$0xff] %v497_v34  ;;  %v246_v34 = vsel %vm245_vm7, %v877_v23, -inf }
 0x210   :  { %533 = vst [vmem:[#allocation1 + $0x5] ss:$9 sm:$0xff] %v460_v32  ;;  %v256_v32 = vsel %vm245_vm7, %v911_v56, -inf  ;;  %v732_v56 = vld [vmem:[%s1017_s4] ss:$0 sm:$0xff] }
 0x211   :  { %534 = vst [vmem:[#allocation1 + $0x6] ss:$9 sm:$0xff] %v499_v36  ;;  %v258_v33 = vmax.f32 %v256_v32, %v257_v31  ;;  %v249_v36 = vmax.f32 %v246_v34, %v248_v53 }
 0x212   :  { %535 = vst [vmem:[#allocation1 + $0x7] ss:$9 sm:$0xff] %v500_v38 }
 0x213   :  { %v259_v38 = vrot.slane %v258_v33, 4 }
 0x219   :  { %v536_v41 = vld [vmem:[#allocation1] sm:$0xff] }
 0x21a   :  { %566 = vmatmul.f32.gmra.mxu3 %v536_v41  ;;  %537 = vst [vmem:[#allocation1] ss:$9 sm:$0xff] %v501_v39  ;;  %v250_v39 = vrot.slane %v249_v36, 4 }
 0x21b   :  { %538 = vst [vmem:[#allocation1 + $0x1] ss:$9 sm:$0xff] %v502_v40  ;;  %v260_v40 = vmax.f32 %v258_v33, %v259_v38 }
 0x21c   :  { %v251_v41 = vmax.f32 %v249_v36, %v250_v39 }
 0x222   :  { %v539_v42 = vld [vmem:[#allocation1] sm:$0xff] }
 0x223   :  { %569 = vmatmul.f32.gmra.mxu3 %v539_v42  ;;  %v261_v42 = vrot.slane %v260_v40, 2 }
 0x27f   :  { %v561_v50 = vpop.f32.mrf.mxu2 }
 0x280   :  { %v577_v43 = vrot.slane %v561_v50, 1  ;;  %v578_v44 = vrot.slane %v561_v50, 2  ;;  %v579_v45 = vrot.slane %v561_v50, 3  ;;  %599 = vst [vmem:[#allocation1] ss:$9 sm:$0xff] %v561_v50  ;;  %v580_v47 = vrot.slane %v561_v50, 4 }
 0x281   :  { %v581_v48 = vrot.slane %v561_v50, 5  ;;  %v582_v49 = vrot.slane %v561_v50, 6  ;;  %v583_v51 = vrot.slane %v561_v50, 7  ;;  %v252_v50 = vrot.slane %v251_v41, 2 }
 0x282   :  { %601 = vst [vmem:[#allocation1 + $0x1] ss:$9 sm:$0xff] %v577_v43  ;;  %v262_v43 = vmax.f32 %v260_v40, %v261_v42 }
 0x283   :  { %603 = vst [vmem:[#allocation1 + $0x2] ss:$9 sm:$0xff] %v578_v44  ;;  %v253_v44 = vmax.f32 %v251_v41, %v252_v50 }
 0x284   :  { %605 = vst [vmem:[#allocation1 + $0x3] ss:$9 sm:$0xff] %v579_v45  ;;  %v263_v45 = vrot.slane %v262_v43, 1 }
 0x285   :  { %607 = vst [vmem:[#allocation1 + $0x4] ss:$9 sm:$0xff] %v580_v47  ;;  %v254_v0 = vrot.slane %v253_v44, 1 }
 0x286   :  { %609 = vst [vmem:[#allocation1 + $0x5] ss:$9 sm:$0xff] %v581_v48  ;;  %v264_v47 = vmax.f32 %v262_v43, %v263_v45  ;;  %v668_v48 = vpop.permute.xlu0 %667 }
 0x287   :  { %611 = vst [vmem:[#allocation1 + $0x6] ss:$9 sm:$0xff] %v582_v49  ;;  %v255_v35 = vmax.f32 %v253_v44, %v254_v0 }
 0x288   :  { %613 = vst [vmem:[#allocation1 + $0x7] ss:$9 sm:$0xff] %v583_v51 }
 0x289   :  { %v662_v23 = vsel %vm661_vm8, %v264_v47, %v255_v35 }
 0x28a   :  { %v676_v49 = vsel %vm245_vm7, %v662_v23, %v668_v48 }
 0x28e   :  { %v564_v52 = vpop.f32.mrf.mxu3 }
 0x28f   :  { %v584_v37 = vrot.slane %v564_v52, 1  ;;  %v585_v54 = vrot.slane %v564_v52, 2  ;;  %v586_v55 = vrot.slane %v564_v52, 3  ;;  %v614_v57 = vld [vmem:[#allocation1] sm:$0xff]  ;;  %v587_v58 = vrot.slane %v564_v52, 4 }
 0x290   :  { %615 = vst [vmem:[#allocation1] ss:$9 sm:$0xff] %v564_v52  ;;  %v588_v59 = vrot.slane %v564_v52, 5  ;;  %v589_v60 = vrot.slane %v564_v52, 6  ;;  %v590_v62 = vrot.slane %v564_v52, 7  ;;  %v640_v12 = vsel %vm245_vm7, %v614_v57, -inf }
 0x291   :  { %616 = vst [vmem:[#allocation1 + $0x1] ss:$9 sm:$0xff] %v584_v37 }
 0x292   :  { %617 = vst [vmem:[#allocation1 + $0x2] ss:$9 sm:$0xff] %v585_v54 }
 0x293   :  { %618 = vst [vmem:[#allocation1 + $0x3] ss:$9 sm:$0xff] %v586_v55 }
 0x294   :  { %619 = vst [vmem:[#allocation1 + $0x4] ss:$9 sm:$0xff] %v587_v58 }
 0x29b   :  { %v620_v61 = vld [vmem:[#allocation1] sm:$0xff] }
 0x29c   :  { %621 = vst [vmem:[#allocation1] ss:$9 sm:$0xff] %v588_v59  ;;  %v642_v7 = vsel %vm641_vm9, %v620_v61, -inf }
 0x29d   :  { %v567_v63 = vpop.f32.mrf.mxu3  ;;  %622 = vst [vmem:[#allocation1 + $0x1] ss:$9 sm:$0xff] %v589_v60  ;;  %v643_v13 = vmax.f32 %v640_v12, %v642_v7 }
 0x29e   :  { %v591_v1 = vrot.slane %v567_v63, 1  ;;  %v592_v2 = vrot.slane %v567_v63, 2  ;;  %v593_v3 = vrot.slane %v567_v63, 3  ;;  %623 = vst [vmem:[#allocation1 + $0x2] ss:$9 sm:$0xff] %v590_v62  ;;  %v594_v4 = vrot.slane %v567_v63, 4 }
 0x29f   :  { %624 = vst [vmem:[#allocation1 + $0x3] ss:$9 sm:$0xff] %v567_v63  ;;  %v595_v6 = vrot.slane %v567_v63, 5  ;;  %v596_v8 = vrot.slane %v567_v63, 6  ;;  %v597_v10 = vrot.slane %v567_v63, 7  ;;  %v644_v14 = vrot.slane %v643_v13, 4 }
 0x2a0   :  { %625 = vst [vmem:[#allocation1 + $0x4] ss:$9 sm:$0xff] %v591_v1 }
 0x2a1   :  { %626 = vst [vmem:[#allocation1 + $0x5] ss:$9 sm:$0xff] %v592_v2  ;;  %v645_v15 = vmax.f32 %v643_v13, %v644_v14 }
 0x2a2   :  { %627 = vst [vmem:[#allocation1 + $0x6] ss:$9 sm:$0xff] %v593_v3 }
 0x2a3   :  { %628 = vst [vmem:[#allocation1 + $0x7] ss:$9 sm:$0xff] %v594_v4  ;;  %v646_v19 = vrot.slane %v645_v15, 2 }
 0x2a5   :  { %v647_v22 = vmax.f32 %v645_v15, %v646_v19 }
 0x2a6   :  { %v570_v5 = vpop.f32.mrf.mxu3 }
 0x2a7   :  { %v598_v11 = vrot.slane %v570_v5, 1  ;;  %v648_v26 = vrot.slane %v647_v22, 1 }
 0x2a9   :  { %v649_v28 = vmax.f32 %v647_v22, %v648_v26 }
 0x2aa   :  { %v629_v9 = vld [vmem:[#allocation1] sm:$0xff] }
 0x2ab   :  { %630 = vst [vmem:[#allocation1] ss:$9 sm:$0xff] %v595_v6  ;;  %v650_v17 = vsel %vm245_vm7, %v629_v9, -inf }
 0x2ac   :  { %631 = vst [vmem:[#allocation1 + $0x1] ss:$9 sm:$0xff] %v596_v8 }
 0x2ad   :  { %632 = vst [vmem:[#allocation1 + $0x2] ss:$9 sm:$0xff] %v597_v10 }
 0x2ae   :  { %633 = vst [vmem:[#allocation1 + $0x3] ss:$9 sm:$0xff] %v570_v5 }
 0x2af   :  { %634 = vst [vmem:[#allocation1 + $0x4] ss:$9 sm:$0xff] %v598_v11 }
 0x2b6   :  { %v635_v16 = vld [vmem:[#allocation1] sm:$0xff] }
 0x2b7   :  { %v651_v18 = vsel %vm641_vm9, %v635_v16, -inf }
 0x2b8   :  { %v652_v20 = vmax.f32 %v650_v17, %v651_v18 }
 0x2ba   :  { %v653_v21 = vrot.slane %v652_v20, 4 }
 0x2bc   :  { %v654_v24 = vmax.f32 %v652_v20, %v653_v21 }
 0x2be   :  { %v655_v25 = vrot.slane %v654_v24, 2 }
 0x2c0   :  { %v656_v46 = vmax.f32 %v654_v24, %v655_v25 }
 0x2c2   :  { %v657_v27 = vrot.slane %v656_v46, 1 }
 0x2c4   :  { %v658_v29 = vmax.f32 %v656_v46, %v657_v27 }
 0x2c6   :  { %v672_v30 = vsel %vm661_vm8, %v658_v29, %v649_v28 }
 0x2c7   :  { %673 = vrot.lane.b32.xlu1 %v672_v30, %s763_s1 }
 0x339   :  { %v674_v51 = vpop.permute.xlu1 %673 }
 0x33a   :  { %v678_v52 = vsel %vm677_vm11, %v676_v49, %v674_v51 }
 0x33b   :  { %v683_v37 = vadd.f32 %v732_v56, %v678_v52 }
 0x33d   :  { %685 = vst.msk [vmem:[#allocation2] sm:$0x3] %vm684_vm12, %v683_v37 }
 0x33e   :  { %696 = dma.vmem_to_hbm [thread:$0]  %s692_s22, 32, %s694_s25, [#allocation3]  }
 0x33f   :  { %757 = dma.done.wait [#allocation3], 32  }
 0x340   :  { %758 = vsyncadd [#allocation3], 4294967264 }
 0x341   :  { %701 = vsyncpa [#allocation3], 1 }

</bundles_post_ra>
